<compile_context>
chip_gen: v7x
topology: tpu7x:2x2x1
jax: 0.10.0
libtpu: 0.0.40
codegen_flags: <defaults>
</compile_context>

<pallas_src>
import functools

import jax
import jax.numpy as jnp
from jax.experimental import pallas as pl
from jax.experimental.pallas import tpu as pltpu


_VMEM_BUDGET = 24 * 1024 * 1024          # conservative buffer budget (all gens)
_VMEM_LIMIT = 32 * 1024 * 1024           # scoped VMEM limit passed to Mosaic
_RESIDENT_CENTERS_MAX_BYTES = 4 * 1024 * 1024  # switch to HBM gather above this


def _round_up(n, m):
    return ((n + m - 1) // m) * m


# ----------------------------------------------------------------------------
# Path A (default): centers resident in VMEM, one-hot gather on the MXU.
# ----------------------------------------------------------------------------
def _resident_kernel(x_ref, lbl_ref, centers_ref, out_ref, *,
                     batch, batch_tile, tiles_per_chunk, pad_exists):
    c_idx = pl.program_id(0)          # chunk (parallel -> second TC on v7x)
    t = pl.program_id(1)              # tile within chunk (reduction)

    @pl.when(t == 0)
    def _init():
        out_ref[...] = jnp.zeros_like(out_ref)

    num_classes = centers_ref.shape[0]

    # Gather centers[labels] for this tile as a one-hot matmul on the MXU.
    lbl = lbl_ref[...]                                                # (TB, 1) int32
    class_ids = jax.lax.broadcasted_iota(
        jnp.int32, (batch_tile, num_classes), 1)                      # (TB, C)
    onehot = (lbl == class_ids).astype(centers_ref.dtype)             # (TB, C)
    gathered = jnp.dot(onehot, centers_ref[...],
                       preferred_element_type=jnp.float32)            # (TB, D) f32

    diff = x_ref[...].astype(jnp.float32) - gathered
    d = jnp.sum(diff * diff, axis=1, keepdims=True)                   # (TB, 1)
    d = jnp.clip(d, 1e-12, 1e12)      # clamp of the labeled entry (PyTorch)

    if pad_exists:
        # Zero out rows that only exist because batch was padded to the grid.
        row0 = (c_idx * tiles_per_chunk + t) * batch_tile
        row_ids = row0 + jax.lax.broadcasted_iota(jnp.int32, (batch_tile, 1), 0)
        d = jnp.where(row_ids < batch, d, 0.0)

    # Scalar partial accumulated into a lane-dense resident output block.
    out_ref[...] += jnp.sum(d)


def _center_loss_resident(x, centers, labels_i32, batch_tile):
    B, D = x.shape
    C, _ = centers.shape
    x_isz = jnp.dtype(x.dtype).itemsize
    c_isz = jnp.dtype(centers.dtype).itemsize

    if batch_tile is None:
        reserve = 2 * C * D * c_isz + 64 * 1024          # resident centers + misc
        per_row = 2 * D * x_isz + 2 * 4                  # double-buffered x + labels
        cap = max(8, (_VMEM_BUDGET - reserve) // per_row)
        batch_tile = min(1024, cap, _round_up(B, 8))
    batch_tile = max(8, (int(batch_tile) // 8) * 8)

    num_tiles = -(-B // batch_tile)
    num_chunks = 2 if num_tiles >= 2 else 1              # expose 2nd TC on v7x
    tiles_per_chunk = -(-num_tiles // num_chunks)
    Bp = num_chunks * tiles_per_chunk * batch_tile
    pad_exists = Bp != B

    if pad_exists:
        x_in = jnp.pad(x, ((0, Bp - B), (0, 0)))
        lbl_in = jnp.pad(labels_i32, (0, Bp - B))        # class 0 = valid gather
    else:
        x_in, lbl_in = x, labels_i32
    lbl2d = lbl_in.reshape(Bp, 1)

    kernel = functools.partial(
        _resident_kernel, batch=B, batch_tile=batch_tile,
        tiles_per_chunk=tiles_per_chunk, pad_exists=pad_exists)

    out = pl.pallas_call(
        kernel,
        out_shape=jax.ShapeDtypeStruct((num_chunks, 8, 128), jnp.float32),
        grid_spec=pltpu.PrefetchScalarGridSpec(
            num_scalar_prefetch=0,
            grid=(num_chunks, tiles_per_chunk),
            in_specs=[
                # x streams in batch tiles (auto double-buffered by BlockSpec).
                pl.BlockSpec((batch_tile, D),
                             lambda c, t: (c * tiles_per_chunk + t, 0)),
                # per-tile labels (int32) in VMEM for the one-hot build.
                pl.BlockSpec((batch_tile, 1),
                             lambda c, t: (c * tiles_per_chunk + t, 0)),
                # centers resident in VMEM: fetched from HBM once (constant index).
                pl.BlockSpec((C, D), lambda c, t: (0, 0)),
            ],
            out_specs=pl.BlockSpec((1, 8, 128), lambda c, t: (c, 0, 0)),
        ),
        compiler_params=pltpu.CompilerParams(
            dimension_semantics=("parallel", "arbitrary"),
            vmem_limit_bytes=_VMEM_LIMIT,
        ),
    )(x_in, lbl2d, centers)
    return out[:, 0, 0]                                  # per-chunk partial sums


# ----------------------------------------------------------------------------
# Path B (very large C): HBM row gather, double-buffered across grid steps
# with per-slot DMA semaphores.
# ----------------------------------------------------------------------------
def _gather_kernel(labels_ref, x_ref, centers_hbm, out_ref, cbuf, sem, *,
                   batch, batch_tile, pad_exists):
    t = pl.program_id(0)
    nt = pl.num_programs(0)

    def issue(tile_idx, slot):
        # Gather centers[labels[row]] for every row of tile `tile_idx` into
        # cbuf[slot]; all copies of a slot share that slot's semaphore.
        for i in range(batch_tile):
            row = labels_ref[tile_idx * batch_tile + i]
            pltpu.make_async_copy(
                centers_hbm.at[row], cbuf.at[slot, i], sem.at[slot]).start()

    @pl.when(t == 0)
    def _prime():
        issue(0, 0)

    @pl.when(t + 1 < nt)
    def _prefetch():                                     # overlap next tile's gather
        issue(t + 1, (t + 1) % 2)

    @pl.when(t == 0)
    def _init():
        out_ref[...] = jnp.zeros_like(out_ref)

    slot = t % 2
    # Wait for all rows of the current slot (only this slot's copies signal it).
    for i in range(batch_tile):
        pltpu.make_async_copy(
            centers_hbm.at[0], cbuf.at[slot, i], sem.at[slot]).wait()

    diff = x_ref[...].astype(jnp.float32) - cbuf[slot].astype(jnp.float32)
    d = jnp.clip(jnp.sum(diff * diff, axis=1, keepdims=True), 1e-12, 1e12)
    if pad_exists:
        row_ids = t * batch_tile + jax.lax.broadcasted_iota(
            jnp.int32, (batch_tile, 1), 0)
        d = jnp.where(row_ids < batch, d, 0.0)
    out_ref[...] += jnp.sum(d)


def _center_loss_gather(x, centers, labels_i32, batch_tile):
    B, D = x.shape
    C, _ = centers.shape
    x_isz = jnp.dtype(x.dtype).itemsize
    c_isz = jnp.dtype(centers.dtype).itemsize

    if batch_tile is None:
        per_row = 2 * D * (x_isz + c_isz) + 8            # x block + cbuf, both 2-deep
        cap = max(8, _VMEM_BUDGET // per_row)
        batch_tile = min(128, cap, _round_up(B, 8))      # keep unrolled gather short
    batch_tile = max(8, (int(batch_tile) // 8) * 8)

    num_tiles = -(-B // batch_tile)
    Bp = num_tiles * batch_tile
    pad_exists = Bp != B
    if pad_exists:
        x_in = jnp.pad(x, ((0, Bp - B), (0, 0)))
        lbl_in = jnp.pad(labels_i32, (0, Bp - B))
    else:
        x_in, lbl_in = x, labels_i32

    kernel = functools.partial(
        _gather_kernel, batch=B, batch_tile=batch_tile, pad_exists=pad_exists)

    out = pl.pallas_call(
        kernel,
        out_shape=jax.ShapeDtypeStruct((1, 8, 128), jnp.float32),
        grid_spec=pltpu.PrefetchScalarGridSpec(
            num_scalar_prefetch=1,                       # labels -> SMEM
            grid=(num_tiles,),
            in_specs=[
                pl.BlockSpec((batch_tile, D), lambda t, lbl: (t, 0)),
                pl.BlockSpec(memory_space=pl.ANY),       # centers stay in HBM
            ],
            out_specs=pl.BlockSpec((1, 8, 128), lambda t, lbl: (0, 0, 0)),
            scratch_shapes=[
                pltpu.VMEM((2, batch_tile, D), centers.dtype),  # double buffer
                pltpu.SemaphoreType.DMA((2,)),                   # per-slot sems
            ],
        ),
        compiler_params=pltpu.CompilerParams(
            dimension_semantics=("arbitrary",),
            vmem_limit_bytes=_VMEM_LIMIT,
        ),
    )(lbl_in, x_in, centers)
    return out[:, 0, 0]


# ----------------------------------------------------------------------------
# Public wrapper: CenterLoss forward.
# ----------------------------------------------------------------------------
def center_loss(x, centers, labels, *, batch_tile=None):
    """x: (B, D), centers: (C, D), labels: (B,) int -> scalar float32 loss."""
    B, D = x.shape
    C, Dc = centers.shape
    assert D == Dc, "feature dims must match"
    labels_i32 = labels.astype(jnp.int32)

    centers_bytes = C * D * jnp.dtype(centers.dtype).itemsize
    if centers_bytes <= _RESIDENT_CENTERS_MAX_BYTES:
        partials = _center_loss_resident(x, centers, labels_i32, batch_tile)
    else:
        partials = _center_loss_gather(x, centers, labels_i32, batch_tile)

    total = jnp.sum(partials)
    # clamp-after-mask semantics: each of the (C-1) masked-out entries per
    # sample contributes exactly 1e-12 to the pre-division sum.
    bias = jnp.float32(float(B) * float(C - 1) * 1e-12)
    return (total + bias) / jnp.float32(B)


if __name__ == "__main__":
    num_classes = 2
    feat_dim = 128
    batch_size = 8

    key = jax.random.PRNGKey(0)
    k_centers, k_x, k_labels = jax.random.split(key, 3)

    # Deterministic "parameter" init (stands in for nn.Parameter(torch.randn(...)))
    centers = jax.random.normal(k_centers, (num_classes, feat_dim), dtype=jnp.float32)
    x = jax.random.normal(k_x, (batch_size, feat_dim), dtype=jnp.float32)
    labels = jax.random.randint(k_labels, (batch_size,), 0, num_classes, dtype=jnp.int32)

    loss = center_loss(x, centers, labels)
    jax.block_until_ready(loss)

    # Pure-JAX reference with the exact PyTorch-module semantics
    # (full distmat expansion, mask, clamp-after-mask, mean over batch).
    x_sq = jnp.sum(x * x, axis=1, keepdims=True)
    c_sq = jnp.sum(centers * centers, axis=1, keepdims=True)
    distmat = x_sq + c_sq.T - 2.0 * (x @ centers.T)
    mask = (labels[:, None] == jnp.arange(num_classes)[None, :]).astype(jnp.float32)
    ref = jnp.sum(jnp.clip(distmat * mask, 1e-12, 1e12)) / batch_size

    assert jnp.allclose(loss, ref, rtol=1e-5, atol=1e-3), (loss, ref)
    print("KERNEL_OK")
</pallas_src>

<mosaic_0001>
module attributes {stable_mosaic.version = 11 : i64} {
  func.func @_resident_kernel(%arg0: i32, %arg1: i32, %arg2: memref<8x128xf32, #tpu.memory_space<vmem>>, %arg3: memref<8x1xi32, #tpu.memory_space<vmem>>, %arg4: memref<2x128xf32, #tpu.memory_space<vmem>>, %arg5: memref<1x8x128xf32, #tpu.memory_space<vmem>>) attributes {dimension_semantics = [#tpu.dimension_semantics<parallel>, #tpu.dimension_semantics<arbitrary>], iteration_bounds = array<i64: 1, 1>, scalar_prefetch = 0 : i64, scratch_operands = 0 : i64, tpu.core_type = #tpu.core_type<tc>, window_params = [{transform_indices = @transform_0, window_bounds = array<i64: 8, 128>}, {transform_indices = @transform_1, window_bounds = array<i64: 8, 1>}, {pipeline_mode = #tpu.pipeline_mode<synchronous>, transform_indices = @transform_2, window_bounds = array<i64: 2, 128>}, {transform_indices = @transform_3, window_bounds = array<i64: 1, 8, 128>}]} {
    %c0_i32 = arith.constant 0 : i32
    %0 = arith.cmpi eq, %arg1, %c0_i32 : i32
    %1 = arith.extui %0 : i1 to i32
    %c0_i32_0 = arith.constant 0 : i32
    %2 = arith.cmpi ne, %1, %c0_i32_0 : i32
    scf.if %2 {
      %cst_16 = arith.constant 0.000000e+00 : f32
      %28 = vector.broadcast %cst_16 : f32 to vector<1x8x128xf32>
      %c0_17 = arith.constant 0 : index
      %c0_18 = arith.constant 0 : index
      %c0_19 = arith.constant 0 : index
      %29 = vector.load %arg5[%c0_17, %c0_18, %c0_19] : memref<1x8x128xf32, #tpu.memory_space<vmem>>, vector<1x8x128xf32>
      tpu.vector_store %arg5[%c0_17, %c0_18, %c0_19], %28 {strides = array<i32>} : memref<1x8x128xf32, #tpu.memory_space<vmem>>, vector<1x8x128xf32>,
    } else {
    }
    %c0 = arith.constant 0 : index
    %c0_1 = arith.constant 0 : index
    %3 = vector.load %arg3[%c0, %c0_1] : memref<8x1xi32, #tpu.memory_space<vmem>>, vector<8x1xi32>
    %4 = tpu.iota {dimensions = array<i32: 1>} : vector<8x2xi32>
    %5 = vector.broadcast %3 : vector<8x1xi32> to vector<8x2xi32>
    %6 = arith.cmpi eq, %5, %4 : vector<8x2xi32>
    %7 = arith.extui %6 : vector<8x2xi1> to vector<8x2xi32>
    %8 = arith.sitofp %7 : vector<8x2xi32> to vector<8x2xf32>
    %c0_2 = arith.constant 0 : index
    %c0_3 = arith.constant 0 : index
    %9 = vector.load %arg4[%c0_2, %c0_3] : memref<2x128xf32, #tpu.memory_space<vmem>>, vector<2x128xf32>
    %cst = arith.constant dense<0.000000e+00> : vector<8x128xf32>
    %10 = tpu.matmul %8, %9, %cst {dimension_numbers = #tpu.dot_dimension_numbers<[1], [0], [0], [1], [0, 0, 1, 1], [], []>} : vector<8x2xf32>, vector<2x128xf32>, vector<8x128xf32> -> vector<8x128xf32>
    %c0_4 = arith.constant 0 : index
    %c0_5 = arith.constant 0 : index
    %11 = vector.load %arg2[%c0_4, %c0_5] : memref<8x128xf32, #tpu.memory_space<vmem>>, vector<8x128xf32>
    %12 = arith.subf %11, %10 : vector<8x128xf32>
    %13 = arith.mulf %12, %12 : vector<8x128xf32>
    %cst_6 = arith.constant dense<0.000000e+00> : vector<8xf32>
    %14 = vector.multi_reduction <add>, %13, %cst_6 [1] : vector<8x128xf32> to vector<8xf32>
    %15 = vector.shape_cast %14 : vector<8xf32> to vector<8x1xf32>
    %cst_7 = arith.constant 9.99999996E-13 : f32
    %cst_8 = arith.constant 9.99999995E+11 : f32
    %16 = vector.broadcast %cst_7 : f32 to vector<8x1xf32>
    %17 = arith.maximumf %16, %15 : vector<8x1xf32>
    %18 = vector.broadcast %cst_8 : f32 to vector<8x1xf32>
    %19 = arith.minimumf %18, %17 : vector<8x1xf32>
    %c0_9 = arith.constant 0 : index
    %c0_10 = arith.constant 0 : index
    %c0_11 = arith.constant 0 : index
    %20 = vector.load %arg5[%c0_9, %c0_10, %c0_11] : memref<1x8x128xf32, #tpu.memory_space<vmem>>, vector<1x8x128xf32>
    %21 = vector.shape_cast %19 : vector<8x1xf32> to vector<1x8x1xf32>
    %cst_12 = arith.constant dense<0.000000e+00> : vector<1xf32>
    %22 = vector.multi_reduction <add>, %21, %cst_12 [1, 2] : vector<1x8x1xf32> to vector<1xf32>
    %23 = vector.shape_cast %22 : vector<1xf32> to vector<1x1x1xf32>
    %24 = vector.extract %23[0, 0, 0] : f32 from vector<1x1x1xf32>
    %25 = vector.broadcast %24 : f32 to vector<1x8x128xf32>
    %26 = arith.addf %20, %25 : vector<1x8x128xf32>
    %c0_13 = arith.constant 0 : index
    %c0_14 = arith.constant 0 : index
    %c0_15 = arith.constant 0 : index
    %27 = vector.load %arg5[%c0_13, %c0_14, %c0_15] : memref<1x8x128xf32, #tpu.memory_space<vmem>>, vector<1x8x128xf32>
    tpu.vector_store %arg5[%c0_13, %c0_14, %c0_15], %26 {strides = array<i32>} : memref<1x8x128xf32, #tpu.memory_space<vmem>>, vector<1x8x128xf32>,
    return
  }
  func.func @transform_0(%arg0: i32, %arg1: i32) -> (i32, i32) {
    %c1_i32 = arith.constant 1 : i32
    %0 = arith.muli %arg0, %c1_i32 : i32
    %1 = arith.addi %0, %arg1 : i32
    %c0_i32 = arith.constant 0 : i32
    %c0_i32_0 = arith.constant 0 : i32
    return %1, %c0_i32 : i32, i32
  }
  func.func @transform_1(%arg0: i32, %arg1: i32) -> (i32, i32) {
    %c1_i32 = arith.constant 1 : i32
    %0 = arith.muli %arg0, %c1_i32 : i32
    %1 = arith.addi %0, %arg1 : i32
    %c0_i32 = arith.constant 0 : i32
    %c0_i32_0 = arith.constant 0 : i32
    return %1, %c0_i32 : i32, i32
  }
  func.func @transform_2(%arg0: i32, %arg1: i32) -> (i32, i32) {
    %c0_i32 = arith.constant 0 : i32
    %c0_i32_0 = arith.constant 0 : i32
    %c0_i32_1 = arith.constant 0 : i32
    return %c0_i32, %c0_i32_0 : i32, i32
  }
  func.func @transform_3(%arg0: i32, %arg1: i32) -> (i32, i32, i32) {
    %c0_i32 = arith.constant 0 : i32
    %c0_i32_0 = arith.constant 0 : i32
    %c0_i32_1 = arith.constant 0 : i32
    return %arg0, %c0_i32, %c0_i32_0 : i32, i32, i32
  }
}

</mosaic_0001>

<bundles_post_ra>
// kernel: tpu_custom_call.1
= control target key start
LH: loop header
LB: loop body
LE: loop exit
PB: predicated region body
PF: predicated region fallthrough
CT: control target
= control target key end

     0   :  { %s276_s0 = inlined_call_operand.vmem [shape: f32[8,128], index: 0, kind: input, shape index: {}]   ;;  %s277_s1 = inlined_call_operand.vmem [shape: s32[8,1], index: 1, kind: input, shape index: {}]   ;;  %s278_s2 = inlined_call_operand.vmem [shape: f32[2,128], index: 2, kind: input, shape index: {}]   ;;  %s279_s3 = inlined_call_operand.hbm [shape: f32[1,8,128], index: 3, kind: output, shape index: {}]  }
   0x1   :  { %v54_v0 = vld [vmem:[%s277_s1] sm:$0xff] }
   0x2   :  { %8 = vsyncpa [#allocation3], 0  ;;  %v231_v1 = vmov 0   ;;  %v232_v2 = vmov 0.0   ;;  %v63_v3 = vld [vmem:[%s278_s2] sm:$0x3]  ;;  %v55_v4 = vlaneseq }
   0x3   :  { %206 = vset.pattern.permute.xlu0 %v231_v1  ;;  %195 = vmatprep.subr.mxu0 %v232_v2  ;;  %vm68_vm0 = vcmask 1041408   ;;  %vm233_vm1 = vmmov 0   ;;  %vm64_vm2 = vcmask 15360   ;;  %v142_v8 = vld [vmem:[%s276_s0] sm:$0xff]  ;;  %vm150_vm4 = vcmask 7168   ;;  %s234_s0 = smov [#allocation2]  }
   0x4   :  { %58 = vperm.xlu0 %206, %v54_v0   ;;  %196 = vmatpush3.msk.msra.mxu0 %vm68_vm0, %v63_v3  ;;  %v56_v5 = vand.u32 127, %v55_v4  ;;  %s170_s2 = sshll.u32 %s234_s0, 4  ;;  %s171_s2 = int_to_ptr.vmem [resolvable:$true] %s170_s2 }
   0x5   :  { %197 = vmatprep.mubr.msk.f32.mxu0 %vm233_vm1, %v232_v2  ;;  %s207_s18 = scalar_lea.vmem %s171_s2, 128  ;;  %p212_p1 = scmp.lt.s32.totalorder %s171_s2, %s171_s2 }
   0x6   :  { %p208_p0 = scmp.ne.s32.totalorder %s171_s2, %s207_s18  ;;  %p213_p2 = scmp.lt.s32.totalorder %s207_s18, %s207_s18 }
   0x8   :  { %p214_p3 = por %p213_p2, %p212_p1 }
   0xa   :  { %p215_p4 = pnand %p214_p3, %p208_p0 }
  0x83   :  { %v59_v6 = vpop.permute.xlu0 %58 }
  0x84   :  { %vm60_vm3 = vcmp.eq.s32.totalorder %v59_v6, %v56_v5 }
  0x85   :  { %v190_v7 = vsel %vm60_vm3, 1.0, %v232_v2 }
  0x86   :  { %198 = vmatmul.mubr.msk.f32.vlgmr.msra.gmra.mrb[0].mxu0 %vm64_vm2, %v190_v7 }
 0x159   :  { %v138_v9 = vpop.f32.mrb[0].mxu0 }
 0x15a   :  { %v143_v10 = vsub.f32 %v142_v8, %v138_v9  ;;  %v199_v11 = vpop.f32.mrb[1].mxu0 }
 0x15c   :  { %v144_v12 = vmul.f32 %v143_v10, %v143_v10 }
 0x15e   :  { %145 = vadd.xlane.f32.xlu0 %v144_v12 }
 0x1eb   :  { %v146_v13 = vpop.xlane.xlu0 %145 }
 0x1ec   :  { %v147_v14 = vmax.f32 %v146_v13, 1e-12 }
 0x1ee   :  { %v148_v15 = vmin.f32 %v147_v14, 1e+12 }
 0x1f0   :  { %v151_v16 = vsel %vm150_vm4, %v148_v15, 0.0 }
 0x1f1   :  { %152 = vadd.xlane.f32.xlu1 %v151_v16 }
 0x27e   :  { %v153_v17 = vpop.xlane.xlu1 %152 }
 0x27f   :  { %v154_v18 = vrot.slane %v153_v17, 4 }
 0x281   :  { %v155_v19 = vadd.f32 %v154_v18, %v153_v17 }
 0x283   :  { %v156_v20 = vrot.slane %v155_v19, 2 }
 0x285   :  { %v157_v21 = vadd.f32 %v156_v20, %v155_v19 }
 0x287   :  { %v158_v22 = vrot.slane %v157_v21, 1 }
 0x289   :  { %v159_v23 = vadd.f32 %v158_v22, %v157_v21 }
 0x28b   :  { %200 = vpush %v159_v23 }
 0x2bc   :  { %s201_s17 = spop %200 }
 0x2bd   :  { %v161_v24 = vstv %s201_s17 }
 0x2be   :  { %163 = vst [vmem:[#allocation2] sm:$0xff] %v161_v24 }
 0x2bf   :  { %218 = shalt.err (!%p215_p4)
}
 0x2c0   :  { %s219_s21 = scalar_lea.hbm %s279_s3, 128 }
 0x2c1   :  { %p220_p5 = scmp.ne.s32.totalorder %s279_s3, %s219_s21  ;;  %p223_p6 = scmp.lt.u32.totalorder %s219_s21, %s279_s3 }
 0x2c3   :  { %p225_p7 = pnand %p223_p6, %p220_p5 }
 0x2c5   :  { %228 = shalt.err (!%p225_p7)
}
 0x2c6   :  { %173 = dma.vmem_to_hbm [thread:$0]  %s171_s2, 128, %s279_s3, [#allocation3]  }
 0x2c7   :  { %229 = dma.done.wait [#allocation3], 128  }
 0x2c8   :  { %230 = vsyncadd [#allocation3], 4294967168 }
 0x2c9   :  { %177 = vsyncpa [#allocation3], 1 }

</bundles_post_ra>
